<compile_context>
chip_gen: v7x
topology: tpu7x:2x2x1
jax: 0.10.0
libtpu: 0.0.40
codegen_flags: <defaults>
</compile_context>

<pallas_src>
import math
import jax
import jax.numpy as jnp
from jax.experimental import pallas as pl
from jax.experimental.pallas import tpu as pltpu


def _round_up(a, b):
    return (a + b - 1) // b * b


def classifier_kernel(x_ref, w_ref, b_ref, o_ref):
    # x_ref: (tm, Kp)   w_ref: (Kp, L) block-diagonal   b_ref: (1, L) f32
    # o_ref: (tm, L)
    acc = jnp.dot(x_ref[...], w_ref[...], preferred_element_type=jnp.float32)
    o_ref[...] = (acc + b_ref[...]).astype(o_ref.dtype)


def classifier_forward(inputs, weight, bias, *, tm=None,
                       target_tile_bytes=2 * 1024 * 1024):
    """inputs: (B, S, L, H), weight: (L, H), bias: (L,) -> (B, S, L)."""
    B, S, L, H = inputs.shape
    M = B * S
    K = L * H
    Kp = _round_up(K, 128)                     # lane-dense contraction axis
    itemsize = jnp.dtype(inputs.dtype).itemsize

    # ---- row-tile selection: biggest tile that fits the per-buffer budget ----
    if tm is None:
        tm = target_tile_bytes // max(Kp * itemsize, 1)
        tm = max(8, min(1024, (tm // 8) * 8))
    tm = min(tm, _round_up(M, 8))              # don't exceed (padded) row count
    tm = max(8, (tm // 8) * 8)
    M_pad = _round_up(M, tm)
    grid = (M_pad // tm,)

    # ---- lane-dense input slab (M_pad, Kp) ----
    x = inputs.reshape(M, K)
    if Kp != K:
        x = jnp.pad(x, ((0, 0), (0, Kp - K)))
    if M_pad != M:
        x = jnp.pad(x, ((0, M_pad - M), (0, 0)))

    # ---- block-diagonal weight (Kp, L): Wd[l*H:(l+1)*H, l] = weight[l] ----
    w = weight.astype(inputs.dtype)
    eye = jnp.eye(L, dtype=inputs.dtype)
    Wd = (w[:, :, None] * eye[:, None, :]).reshape(K, L)
    if Kp != K:
        Wd = jnp.pad(Wd, ((0, Kp - K), (0, 0)))

    b2d = bias.reshape(1, L).astype(jnp.float32)

    # ---- VMEM budget: double-buffered input tile + weight + bias + output ----
    vmem_est = (2 * tm * Kp * itemsize          # input tile (double-buffered)
                + 2 * Kp * L * itemsize         # block-diagonal weight
                + 2 * 1 * L * 4                 # bias
                + 2 * tm * L * itemsize)        # output tile
    vmem_limit = int(min(max(2 * vmem_est, 16 * 1024 * 1024), 32 * 1024 * 1024))

    out = pl.pallas_call(
        classifier_kernel,
        out_shape=jax.ShapeDtypeStruct((M_pad, L), inputs.dtype),
        grid_spec=pltpu.PrefetchScalarGridSpec(
            num_scalar_prefetch=0,
            grid=grid,
            in_specs=[
                pl.BlockSpec((tm, Kp), lambda i: (i, 0)),
                pl.BlockSpec((Kp, L), lambda i: (0, 0)),
                pl.BlockSpec((1, L), lambda i: (0, 0)),
            ],
            out_specs=pl.BlockSpec((tm, L), lambda i: (i, 0)),
        ),
        compiler_params=pltpu.CompilerParams(
            dimension_semantics=("parallel",),
            vmem_limit_bytes=vmem_limit,
        ),
    )(x, Wd, b2d)

    return out[:M].reshape(B, S, L)


def init_params(key, num_labels, hidden_size, dtype=jnp.float32):
    """Deterministic re-implementation of the PyTorch kaiming_uniform_ init."""
    kw, kb = jax.random.split(key)
    # kaiming_uniform_(a=sqrt(5)): gain = sqrt(2/(1+a^2)) = sqrt(1/3),
    # bound = gain * sqrt(3/fan_in) = 1/sqrt(fan_in)
    fan_in = hidden_size
    bound = 1.0 / math.sqrt(fan_in)
    weight = jax.random.uniform(
        kw, (num_labels, hidden_size), dtype, minval=-bound, maxval=bound
    )
    bias = jax.random.uniform(
        kb, (num_labels,), dtype, minval=-bound, maxval=bound
    )
    return weight, bias


def _reference(inputs, weight, bias):
    return jnp.sum(inputs * weight[None, None, :, :], axis=-1) + bias[None, None, :]


if __name__ == "__main__":
    key = jax.random.PRNGKey(0)
    k_in, k_in2, k_params = jax.random.split(key, 3)

    batch, seq, num_labels, hidden = 2, 8, 4, 32
    inputs = jax.random.normal(k_in, (batch, seq, num_labels, hidden), jnp.float32)
    weight, bias = init_params(k_params, num_labels, hidden)

    out = classifier_forward(inputs, weight, bias)
    out = jax.block_until_ready(out)

    ref = _reference(inputs, weight, bias)
    assert out.shape == (batch, seq, num_labels)
    assert jnp.allclose(out, ref, atol=1e-4, rtol=1e-4)

    # Ragged case: batch*seq not a multiple of the row tile (exercises padding).
    inputs2 = jax.random.normal(k_in2, (3, 5, num_labels, hidden), jnp.float32)
    out2 = jax.block_until_ready(classifier_forward(inputs2, weight, bias))
    ref2 = _reference(inputs2, weight, bias)
    assert out2.shape == (3, 5, num_labels)
    assert jnp.allclose(out2, ref2, atol=1e-4, rtol=1e-4)

    print("KERNEL_OK")
</pallas_src>

<mosaic_0001>
module attributes {stable_mosaic.version = 11 : i64} {
  func.func @classifier_kernel(%arg0: i32, %arg1: memref<16x128xf32, #tpu.memory_space<vmem>>, %arg2: memref<128x4xf32, #tpu.memory_space<vmem>>, %arg3: memref<1x4xf32, #tpu.memory_space<vmem>>, %arg4: memref<16x4xf32, #tpu.memory_space<vmem>>) attributes {dimension_semantics = [#tpu.dimension_semantics<parallel>], iteration_bounds = array<i64: 1>, scalar_prefetch = 0 : i64, scratch_operands = 0 : i64, tpu.core_type = #tpu.core_type<tc>, window_params = [{transform_indices = @transform_0, window_bounds = array<i64: 16, 128>}, {pipeline_mode = #tpu.pipeline_mode<synchronous>, transform_indices = @transform_1, window_bounds = array<i64: 128, 4>}, {pipeline_mode = #tpu.pipeline_mode<synchronous>, transform_indices = @transform_2, window_bounds = array<i64: 1, 4>}, {transform_indices = @transform_3, window_bounds = array<i64: 16, 4>}]} {
    %c0 = arith.constant 0 : index
    %c0_0 = arith.constant 0 : index
    %0 = vector.load %arg1[%c0, %c0_0] : memref<16x128xf32, #tpu.memory_space<vmem>>, vector<16x128xf32>
    %c0_1 = arith.constant 0 : index
    %c0_2 = arith.constant 0 : index
    %1 = vector.load %arg2[%c0_1, %c0_2] : memref<128x4xf32, #tpu.memory_space<vmem>>, vector<128x4xf32>
    %cst = arith.constant dense<0.000000e+00> : vector<16x4xf32>
    %2 = tpu.matmul %0, %1, %cst {dimension_numbers = #tpu.dot_dimension_numbers<[1], [0], [0], [1], [0, 0, 1, 1], [], []>} : vector<16x128xf32>, vector<128x4xf32>, vector<16x4xf32> -> vector<16x4xf32>
    %c0_3 = arith.constant 0 : index
    %c0_4 = arith.constant 0 : index
    %3 = vector.load %arg3[%c0_3, %c0_4] : memref<1x4xf32, #tpu.memory_space<vmem>>, vector<1x4xf32>
    %4 = vector.broadcast %3 : vector<1x4xf32> to vector<16x4xf32>
    %5 = arith.addf %2, %4 : vector<16x4xf32>
    %c0_5 = arith.constant 0 : index
    %c0_6 = arith.constant 0 : index
    %6 = vector.load %arg4[%c0_5, %c0_6] : memref<16x4xf32, #tpu.memory_space<vmem>>, vector<16x4xf32>
    tpu.vector_store %arg4[%c0_5, %c0_6], %5 {strides = array<i32>} : memref<16x4xf32, #tpu.memory_space<vmem>>, vector<16x4xf32>,
    return
  }
  func.func @transform_0(%arg0: i32) -> (i32, i32) {
    %c0_i32 = arith.constant 0 : i32
    %c0_i32_0 = arith.constant 0 : i32
    return %arg0, %c0_i32 : i32, i32
  }
  func.func @transform_1(%arg0: i32) -> (i32, i32) {
    %c0_i32 = arith.constant 0 : i32
    %c0_i32_0 = arith.constant 0 : i32
    %c0_i32_1 = arith.constant 0 : i32
    return %c0_i32, %c0_i32_0 : i32, i32
  }
  func.func @transform_2(%arg0: i32) -> (i32, i32) {
    %c0_i32 = arith.constant 0 : i32
    %c0_i32_0 = arith.constant 0 : i32
    %c0_i32_1 = arith.constant 0 : i32
    return %c0_i32, %c0_i32_0 : i32, i32
  }
  func.func @transform_3(%arg0: i32) -> (i32, i32) {
    %c0_i32 = arith.constant 0 : i32
    %c0_i32_0 = arith.constant 0 : i32
    return %arg0, %c0_i32 : i32, i32
  }
}

</mosaic_0001>

<bundles_post_ra>
// kernel: tpu_custom_call.1
= control target key start
LH: loop header
LB: loop body
LE: loop exit
PB: predicated region body
PF: predicated region fallthrough
CT: control target
= control target key end

     0   :  { %vm114_vm0 = vcmask 31744   ;;  %s290_s1 = inlined_call_operand.vmem [shape: f32[128,4], index: 1, kind: input, shape index: {}]   ;;  %s291_s0 = inlined_call_operand.vmem [shape: f32[16,128], index: 0, kind: input, shape index: {}]   ;;  %s292_s2 = inlined_call_operand.vmem [shape: f32[1,4], index: 2, kind: input, shape index: {}]   ;;  %s293_s3 = inlined_call_operand.vmem [shape: f32[16,4], index: 3, kind: output, shape index: {}]  }
   0x1   :  { %v16_v0 = vld [vmem:[%s290_s1] sm:$0xff]  ;;  %v17_v1 = vld [vmem:[%s290_s1 + $0x8] sm:$0xff]  ;;  %v18_v2 = vld [vmem:[%s290_s1 + $0x10] sm:$0xff] }
   0x2   :  { %v175_v3 = vpack.c.bf16 %v17_v1, %v16_v0  ;;  %v19_v4 = vld [vmem:[%s290_s1 + $0x18] sm:$0xff]  ;;  %v20_v6 = vld [vmem:[%s290_s1 + $0x20] sm:$0xff]  ;;  %v21_v7 = vld [vmem:[%s290_s1 + $0x28] sm:$0xff] }
   0x3   :  { %v179_v5 = vpack.c.bf16 %v19_v4, %v18_v2  ;;  %v183_v8 = vpack.c.bf16 %v21_v7, %v20_v6  ;;  %v14_v9 = vld [vmem:[%s291_s0] sm:$0xff]  ;;  %v22_v10 = vld [vmem:[%s290_s1 + $0x30] sm:$0xff]  ;;  %v23_v11 = vld [vmem:[%s290_s1 + $0x38] sm:$0xff] }
   0x4   :  { %176 = vmatprep.subr.bf16.mxu0 %v175_v3  ;;  %172 = vmatprep.mubr.f32.mxu0 %v14_v9  ;;  %v187_v12 = vpack.c.bf16 %v23_v11, %v22_v10  ;;  %v24_v13 = vld [vmem:[%s290_s1 + $0x40] sm:$0xff]  ;;  %v25_v14 = vld [vmem:[%s290_s1 + $0x48] sm:$0xff]  ;;  %v26_v16 = vld [vmem:[%s290_s1 + $0x50] sm:$0xff] }
   0x5   :  { %178 = vmatpush3.bf16.msra.mxu0 %v175_v3  ;;  %v191_v15 = vpack.c.bf16 %v25_v14, %v24_v13  ;;  %v27_v17 = vld [vmem:[%s290_s1 + $0x58] sm:$0xff]  ;;  %v28_v19 = vld [vmem:[%s290_s1 + $0x60] sm:$0xff]  ;;  %v29_v20 = vld [vmem:[%s290_s1 + $0x68] sm:$0xff] }
   0x6   :  { %180 = vmatprep.subr.bf16.mxu0 %v179_v5  ;;  %v195_v18 = vpack.c.bf16 %v27_v17, %v26_v16  ;;  %v199_v21 = vpack.c.bf16 %v29_v20, %v28_v19  ;;  %v30_v22 = vld [vmem:[%s290_s1 + $0x70] sm:$0xff]  ;;  %v31_v23 = vld [vmem:[%s290_s1 + $0x78] sm:$0xff]  ;;  %v15_v25 = vld [vmem:[%s291_s0 + $0x8] sm:$0xff] }
   0x7   :  { %v203_v24 = vpack.c.bf16 %v31_v23, %v30_v22  ;;  %v121_v26 = vld [vmem:[%s292_s2] ss:$0 sm:$0xff] }
   0x9   :  { %182 = vmatpush3.bf16.msra.mxu0 %v179_v5 }
   0xa   :  { %184 = vmatprep.subr.bf16.mxu0 %v183_v8 }
   0xd   :  { %186 = vmatpush3.bf16.msra.mxu0 %v183_v8 }
   0xe   :  { %188 = vmatprep.subr.bf16.mxu0 %v187_v12 }
  0x11   :  { %190 = vmatpush3.bf16.msra.mxu0 %v187_v12 }
  0x12   :  { %192 = vmatprep.subr.bf16.mxu0 %v191_v15 }
  0x15   :  { %194 = vmatpush3.bf16.msra.mxu0 %v191_v15 }
  0x16   :  { %196 = vmatprep.subr.bf16.mxu0 %v195_v18 }
  0x19   :  { %198 = vmatpush3.bf16.msra.mxu0 %v195_v18 }
  0x1a   :  { %200 = vmatprep.subr.bf16.mxu0 %v199_v21 }
  0x1d   :  { %202 = vmatpush3.bf16.msra.mxu0 %v199_v21 }
  0x1e   :  { %204 = vmatprep.subr.bf16.mxu0 %v203_v24 }
  0x21   :  { %206 = vmatpush3.bf16.msra.mxu0 %v203_v24 }
  0x24   :  { %173 = vmatmul.mubr.f32.vlgmr.msra.gmra.mrb[0].mxu0 %v15_v25 }
  0xf7   :  { %v174_v27 = vpop.f32.mrb[0].mxu0 }
  0xf8   :  { %v111_v28 = vadd.f32 %v174_v27, %v121_v26  ;;  %v105_v29 = vpop.f32.mrb[1].mxu0 }
  0xf9   :  { %v106_v30 = vadd.f32 %v121_v26, %v105_v29 }
  0xfa   :  { %116 = vst.msk [vmem:[%s293_s3 + $0x8] sm:$0xff] %vm114_vm0, %v111_v28 }
  0xfb   :  { %115 = vst.msk [vmem:[%s293_s3] sm:$0xff] %vm114_vm0, %v106_v30 }

</bundles_post_ra>
